<compile_context>
chip_gen: v7x
topology: tpu7x:2x2x1
jax: 0.10.0
libtpu: 0.0.40
codegen_flags: <defaults>
</compile_context>

<pallas_src>
import functools

import jax
import jax.numpy as jnp
from jax.experimental import pallas as pl
from jax.experimental.pallas import tpu as pltpu


def _svdd_kernel(n_valid, has_y, emit_per_sample, *refs):
    """One batch tile of the Deep-SVDD loss.

    n_valid         : static int, true batch size N (for edge-tile masking).
    has_y           : static bool, whether an int32 label ref is present.
    emit_per_sample : static bool; True -> store lane-dense per-sample losses,
                      False -> store one tile partial sum (broadcast over 128 lanes).

    refs (in order):
      x_ref   : (D, TN) native-dtype VMEM   features, batch on lanes
      mu_ref  : (D, 1)  f32 VMEM            center (same block every step -> resident)
      r2_ref  : (1,)    f32 SMEM            radius^2
      y_ref   : (1, TN) int32 VMEM          labels (only if has_y)
      out_ref : (1, TN) f32 VMEM            per-sample losses  (emit_per_sample)
                (1, 128) f32 VMEM           tile partial sum   (otherwise)
    """
    if has_y:
        x_ref, mu_ref, r2_ref, y_ref, out_ref = refs
    else:
        x_ref, mu_ref, r2_ref, out_ref = refs

    x = x_ref[...].astype(jnp.float32)                     # (D, TN), cast after DMA
    mu = mu_ref[...].astype(jnp.float32)                   # (D, 1), lane-broadcast
    diff = x - mu
    d2 = jnp.sum(diff * diff, axis=0, keepdims=True)       # (1, TN) sublane reduce (XLU)
    loss = jnp.maximum(d2 - r2_ref[0], 0.0)                # relu(||x - mu||^2 - r^2)

    if has_y:
        loss = jnp.where(y_ref[...] >= 0, loss, 0.0)       # zero OOD samples in-kernel

    if emit_per_sample:
        out_ref[...] = loss                                 # lane-dense (1, TN) store
    else:
        tn = loss.shape[1]
        if n_valid % tn != 0:
            # Mask lanes of the (partially out-of-bounds) last tile before reducing.
            col = pl.program_id(0) * tn + jax.lax.broadcasted_iota(
                jnp.int32, (1, tn), 1)
            loss = jnp.where(col < n_valid, loss, 0.0)
        s = jnp.sum(loss, axis=1, keepdims=True)            # (1, 1) tile partial sum
        out_ref[...] = jnp.broadcast_to(s, out_ref.shape)   # tiny 128-lane slab


def deep_svdd_loss(x, center, radius=0.0, y=None, reduction="mean", block_n=None):
    """JAX/Pallas equivalent of DeepSVDDLoss(n_dim=D, reduction, radius, center)(x, y)."""
    if reduction not in ("mean", "sum", "none", None):
        raise ValueError(f"unsupported reduction: {reduction!r}")

    n, d = x.shape
    # Lane-dense layout: batch on the lane (last) axis.  Layout plumbing only;
    # x keeps its native dtype (no f32 upcast before the DMA).
    xt = jnp.transpose(x)                                           # (D, N)
    mu = jnp.reshape(center, (d, 1)).astype(jnp.float32)            # (D, 1)
    r2 = jnp.reshape(jnp.asarray(radius, jnp.float32) ** 2, (1,))   # (1,) SMEM scalar

    # Batch tile: full batch if it fits in one modest tile, otherwise a multiple
    # of 128 sized for ~2 MiB of x per tile (double-buffered x + labels + output
    # ~= 6-7 MiB total -> safe on v5e/v6e/v7x scoped-VMEM defaults).
    if block_n is None:
        tn = (2 * 1024 * 1024 // max(1, d * x.dtype.itemsize)) // 128 * 128
        tn = max(tn, 128)
    else:
        tn = block_n
    if n <= tn:
        tn = n
    grid = pl.cdiv(n, tn)

    emit_per_sample = reduction is None or reduction == "none"
    has_y = y is not None

    in_specs = [
        pl.BlockSpec((d, tn), lambda i: (0, i)),                # x^T tile, batch on lanes
        pl.BlockSpec((d, 1), lambda i: (0, 0)),                 # center, resident
        pl.BlockSpec(memory_space=pltpu.MemorySpace.SMEM),      # radius^2 scalar
    ]
    args = [xt, mu, r2]
    if has_y:
        in_specs.append(pl.BlockSpec((1, tn), lambda i: (0, i)))  # labels, lane-dense
        args.append(jnp.reshape(y, (1, n)).astype(jnp.int32))

    if emit_per_sample:
        out_shape = jax.ShapeDtypeStruct((1, n), jnp.float32)
        out_specs = pl.BlockSpec((1, tn), lambda i: (0, i))
    else:
        # Independent per-tile partial sums -> grid axis stays "parallel"
        # (shards across both TensorCores on v7x); wrapper does the final sum.
        out_shape = jax.ShapeDtypeStruct((1, grid * 128), jnp.float32)
        out_specs = pl.BlockSpec((1, 128), lambda i: (0, i))

    kernel = functools.partial(_svdd_kernel, n, has_y, emit_per_sample)
    out = pl.pallas_call(
        kernel,
        out_shape=out_shape,
        grid=(grid,),
        in_specs=in_specs,
        out_specs=out_specs,
        compiler_params=pltpu.CompilerParams(
            dimension_semantics=("parallel",),
        ),
    )(*args)

    if emit_per_sample:
        return out[0]                                        # (N,) per-sample losses

    total = out.reshape(grid, 128)[:, 0].sum()               # reduce per-tile partials
    if reduction == "mean":
        # Matches the PyTorch reference: mean over ALL samples (OOD rows are zero).
        return total / n
    return total                                             # 'sum'


if __name__ == "__main__":
    # Small shapes implied by the module: batch N=8 feature vectors of n_dim=32.
    N, D = 8, 32
    key = jax.random.PRNGKey(0)
    kx, kc, kx2 = jax.random.split(key, 3)
    x = jax.random.normal(kx, (N, D), dtype=jnp.float32)
    center = jax.random.normal(kc, (D,), dtype=jnp.float32)

    def ref_loss(x_, c_, r_, y_, reduction_):
        d2 = jnp.sum((x_.astype(jnp.float32) - c_[None, :].astype(jnp.float32)) ** 2, axis=1)
        per = jnp.maximum(d2 - r_ ** 2, 0.0)
        if y_ is not None:
            per = jnp.where(y_ >= 0, per, 0.0)
        if reduction_ == "mean":
            return per.mean()
        if reduction_ == "sum":
            return per.sum()
        return per

    # 1) 'mean', y=None (module default path), f32 features.
    out = jax.block_until_ready(deep_svdd_loss(x, center, radius=0.0, y=None, reduction="mean"))
    assert jnp.allclose(out, ref_loss(x, center, 0.0, None, "mean"), rtol=1e-5, atol=1e-5)

    # 2) 'none' with a mix of IN (>=0) and OOD (<0) labels -> lane-dense per-sample output.
    y = jnp.array([0, 1, -1, 2, -1, 0, 3, 1], dtype=jnp.int32)
    out_ps = jax.block_until_ready(deep_svdd_loss(x, center, radius=0.0, y=y, reduction="none"))
    assert out_ps.shape == (N,)
    assert jnp.allclose(out_ps, ref_loss(x, center, 0.0, y, "none"), rtol=1e-5, atol=1e-5)

    # 3) 'sum' with labels and bf16 features (native dtype kept through the DMA).
    xb = x.astype(jnp.bfloat16)
    out_sum = jax.block_until_ready(deep_svdd_loss(xb, center, radius=0.0, y=y, reduction="sum"))
    assert jnp.allclose(out_sum, ref_loss(xb, center, 0.0, y, "sum"), rtol=1e-3, atol=1e-3)

    # 4) Multi-tile grid with a padded (out-of-bounds) last tile: N=300, block_n=128.
    N2 = 300
    x2 = jax.random.normal(kx2, (N2, D), dtype=jnp.float32)
    y2 = jnp.where(jnp.arange(N2) % 7 == 0, -1, 1).astype(jnp.int32)
    out2 = jax.block_until_ready(
        deep_svdd_loss(x2, center, radius=0.5, y=y2, reduction="mean", block_n=128))
    assert jnp.allclose(out2, ref_loss(x2, center, 0.5, y2, "mean"), rtol=1e-5, atol=1e-5)
    out2n = jax.block_until_ready(
        deep_svdd_loss(x2, center, radius=0.5, y=y2, reduction="none", block_n=128))
    assert out2n.shape == (N2,)
    assert jnp.allclose(out2n, ref_loss(x2, center, 0.5, y2, "none"), rtol=1e-5, atol=1e-5)

    print("KERNEL_OK")
</pallas_src>

<mosaic_0001>
module attributes {stable_mosaic.version = 11 : i64} {
  func.func @_svdd_kernel(%arg0: i32, %arg1: memref<32x8xf32, #tpu.memory_space<vmem>>, %arg2: memref<32x1xf32, #tpu.memory_space<vmem>>, %arg3: memref<1xf32, #tpu.memory_space<smem>>, %arg4: memref<1x128xf32, #tpu.memory_space<vmem>>) attributes {dimension_semantics = [#tpu.dimension_semantics<parallel>], iteration_bounds = array<i64: 1>, scalar_prefetch = 0 : i64, scratch_operands = 0 : i64, tpu.core_type = #tpu.core_type<tc>, window_params = [{transform_indices = @transform_0, window_bounds = array<i64: 32, 8>}, {pipeline_mode = #tpu.pipeline_mode<synchronous>, transform_indices = @transform_1, window_bounds = array<i64: 32, 1>}, {transform_indices = @transform_2, window_bounds = array<i64: 1>}, {transform_indices = @transform_3, window_bounds = array<i64: 1, 128>}]} {
    %c0 = arith.constant 0 : index
    %c0_0 = arith.constant 0 : index
    %0 = vector.load %arg1[%c0, %c0_0] : memref<32x8xf32, #tpu.memory_space<vmem>>, vector<32x8xf32>
    %c0_1 = arith.constant 0 : index
    %c0_2 = arith.constant 0 : index
    %1 = vector.load %arg2[%c0_1, %c0_2] : memref<32x1xf32, #tpu.memory_space<vmem>>, vector<32x1xf32>
    %2 = vector.broadcast %1 : vector<32x1xf32> to vector<32x8xf32>
    %3 = arith.subf %0, %2 : vector<32x8xf32>
    %4 = arith.mulf %3, %3 : vector<32x8xf32>
    %cst = arith.constant dense<0.000000e+00> : vector<8xf32>
    %5 = vector.multi_reduction <add>, %4, %cst [0] : vector<32x8xf32> to vector<8xf32>
    %6 = vector.shape_cast %5 : vector<8xf32> to vector<1x8xf32>
    %c0_3 = arith.constant 0 : index
    %7 = memref.load %arg3[%c0_3] : memref<1xf32, #tpu.memory_space<smem>>
    %8 = vector.broadcast %7 : f32 to vector<1x8xf32>
    %9 = arith.subf %6, %8 : vector<1x8xf32>
    %cst_4 = arith.constant 0.000000e+00 : f32
    %10 = vector.broadcast %cst_4 : f32 to vector<1x8xf32>
    %11 = arith.maximumf %9, %10 : vector<1x8xf32>
    %cst_5 = arith.constant dense<0.000000e+00> : vector<1xf32>
    %12 = vector.multi_reduction <add>, %11, %cst_5 [1] : vector<1x8xf32> to vector<1xf32>
    %13 = vector.shape_cast %12 : vector<1xf32> to vector<1x1xf32>
    %14 = vector.shape_cast %13 : vector<1x1xf32> to vector<1x1xf32>
    %15 = vector.broadcast %14 : vector<1x1xf32> to vector<1x128xf32>
    %c0_6 = arith.constant 0 : index
    %c0_7 = arith.constant 0 : index
    %16 = vector.load %arg4[%c0_6, %c0_7] : memref<1x128xf32, #tpu.memory_space<vmem>>, vector<1x128xf32>
    tpu.vector_store %arg4[%c0_6, %c0_7], %15 {strides = array<i32>} : memref<1x128xf32, #tpu.memory_space<vmem>>, vector<1x128xf32>,
    return
  }
  func.func @transform_0(%arg0: i32) -> (i32, i32) {
    %c0_i32 = arith.constant 0 : i32
    %c0_i32_0 = arith.constant 0 : i32
    return %c0_i32, %arg0 : i32, i32
  }
  func.func @transform_1(%arg0: i32) -> (i32, i32) {
    %c0_i32 = arith.constant 0 : i32
    %c0_i32_0 = arith.constant 0 : i32
    %c0_i32_1 = arith.constant 0 : i32
    return %c0_i32, %c0_i32_0 : i32, i32
  }
  func.func @transform_2(%arg0: i32) -> i32 {
    %c0_i32 = arith.constant 0 : i32
    %c0_i32_0 = arith.constant 0 : i32
    return %c0_i32 : i32
  }
  func.func @transform_3(%arg0: i32) -> (i32, i32) {
    %c0_i32 = arith.constant 0 : i32
    %c0_i32_0 = arith.constant 0 : i32
    return %c0_i32, %arg0 : i32, i32
  }
}

</mosaic_0001>

<bundles_post_ra>
// kernel: tpu_custom_call.1
= control target key start
LH: loop header
LB: loop body
LE: loop exit
PB: predicated region body
PF: predicated region fallthrough
CT: control target
= control target key end

     0   :  { %v116_v2 = vmov 0   ;;  %s182_s0 = inlined_call_operand.vmem [shape: f32[32,8], index: 0, kind: input, shape index: {}]   ;;  %s183_s1 = inlined_call_operand.vmem [shape: f32[32,1], index: 1, kind: input, shape index: {}]   ;;  %s184_s2 = inlined_call_operand.<no memory space> [shape: f32[1], index: 2, kind: input, shape index: {}]   ;;  %s185_s3 = inlined_call_operand.hbm [shape: f32[1,128], index: 3, kind: output, shape index: {}]  }
   0x1   :  { %v22_v0 = vld [vmem:[%s183_s1 + $0x10] sm:$0xff]  ;;  %v20_v1 = vld [vmem:[%s183_s1] sm:$0xff]  ;;  %91 = vset.pattern.permute.xlu1 %v116_v2  ;;  %90 = vset.pattern.permute.xlu0 %v116_v2 }
   0x2   :  { %36 = vperm.xlu1 %91, %v22_v0   ;;  %26 = vperm.xlu0 %90, %v20_v1  }
   0x3   :  { %9 = vsyncpa [#allocation4], 0  ;;  %v23_v3 = vld [vmem:[%s183_s1 + $0x18] sm:$0xff]  ;;  %v21_v4 = vld [vmem:[%s183_s1 + $0x8] sm:$0xff]  ;;  %vm52_vm0 = vcmask 64512   ;;  %v67_v33 = vstv %s184_s2  ;;  %s117_s28 = smov [#allocation3]  }
   0x4   :  { %v16_v5 = vld [vmem:[%s182_s0] sm:$0xff]  ;;  %v18_v7 = vld [vmem:[%s182_s0 + $0x10] sm:$0xff]  ;;  %v19_v10 = vld [vmem:[%s182_s0 + $0x18] sm:$0xff]  ;;  %s80_s29 = sshll.u32 %s117_s28, 4  ;;  %s81_s29 = int_to_ptr.vmem [resolvable:$true] %s80_s29 }
   0x5   :  { %v17_v11 = vld [vmem:[%s182_s0 + $0x8] sm:$0xff]  ;;  %s92_s30 = scalar_lea.vmem %s81_s29, 16  ;;  %s96_s4 = scalar_lea.vmem %s81_s29, 32 }
   0x6   :  { %41 = vperm.xlu1 %91, %v23_v3   ;;  %31 = vperm.xlu0 %90, %v21_v4   ;;  %p93_p0 = scmp.ne.s32.totalorder %s81_s29, %s92_s30  ;;  %p97_p1 = scmp.lt.s32.totalorder %s81_s29, %s81_s29 }
   0x7   :  { %p98_p2 = scmp.lt.s32.totalorder %s96_s4, %s92_s30 }
   0x9   :  { %p99_p3 = por %p98_p2, %p97_p1 }
   0xb   :  { %p100_p4 = pnand %p99_p3, %p93_p0 }
  0x81   :  { %v37_v6 = vpop.permute.xlu1 %36  ;;  %v27_v8 = vpop.permute.xlu0 %26 }
  0x82   :  { %v44_v9 = vsub.f32 %v16_v5, %v27_v8  ;;  %v46_v12 = vsub.f32 %v18_v7, %v37_v6 }
  0x84   :  { %v48_v15 = vmul.f32 %v44_v9, %v44_v9  ;;  %v50_v18 = vmul.f32 %v46_v12, %v46_v12 }
  0x85   :  { %v42_v13 = vpop.permute.xlu1 %41  ;;  %v32_v14 = vpop.permute.xlu0 %31 }
  0x86   :  { %v47_v16 = vsub.f32 %v19_v10, %v42_v13  ;;  %v45_v17 = vsub.f32 %v17_v11, %v32_v14  ;;  %v53_v20 = vsel %vm52_vm0, %v48_v15, 0.0  ;;  %v56_v24 = vsel %vm52_vm0, %v50_v18, 0.0 }
  0x88   :  { %v49_v19 = vmul.f32 %v45_v17, %v45_v17  ;;  %v51_v21 = vmul.f32 %v47_v16, %v47_v16 }
  0x8a   :  { %v54_v22 = vsel %vm52_vm0, %v49_v19, 0.0  ;;  %v58_v26 = vsel %vm52_vm0, %v51_v21, 0.0 }
  0x8b   :  { %v55_v23 = vadd.f32 %v54_v22, %v53_v20 }
  0x8d   :  { %v57_v25 = vadd.f32 %v56_v24, %v55_v23 }
  0x8f   :  { %v59_v27 = vadd.f32 %v58_v26, %v57_v25 }
  0x91   :  { %v60_v28 = vrot.slane %v59_v27, 4 }
  0x93   :  { %v61_v29 = vadd.f32 %v60_v28, %v59_v27 }
  0x95   :  { %v62_v30 = vrot.slane %v61_v29, 2 }
  0x97   :  { %v63_v31 = vadd.f32 %v62_v30, %v61_v29 }
  0x99   :  { %v64_v32 = vrot.slane %v63_v31, 1 }
  0x9b   :  { %v65_v34 = vadd.f32 %v64_v32, %v63_v31 }
  0x9d   :  { %v68_v35 = vsub.f32 %v65_v34, %v67_v33 }
  0x9f   :  { %v69_v36 = vmax.f32 %v68_v35, 0.0 }
  0xa1   :  { %v70_v37 = vsel %vm52_vm0, %v69_v36, 0.0 }
  0xa2   :  { %71 = vadd.xlane.f32.xlu0 %v70_v37 }
 0x12f   :  { %v72_v38 = vpop.xlane.xlu0 %71 }
 0x130   :  { %73 = vst [vmem:[#allocation3] sm:$0x1] %v72_v38 }
 0x131   :  { %103 = shalt.err (!%p100_p4)
}
 0x132   :  { %s104_s6 = scalar_lea.hbm %s185_s3, 16 }
 0x133   :  { %p105_p5 = scmp.ne.s32.totalorder %s185_s3, %s104_s6  ;;  %p108_p6 = scmp.lt.u32.totalorder %s104_s6, %s185_s3 }
 0x135   :  { %p110_p7 = pnand %p108_p6, %p105_p5 }
 0x137   :  { %113 = shalt.err (!%p110_p7)
}
 0x138   :  { %83 = dma.vmem_to_hbm [thread:$0]  %s81_s29, 16, %s185_s3, [#allocation4]  }
 0x139   :  { %114 = dma.done.wait [#allocation4], 16  }
 0x13a   :  { %115 = vsyncadd [#allocation4], 4294967280 }
 0x13b   :  { %87 = vsyncpa [#allocation4], 1 }

</bundles_post_ra>
